<compile_context>
chip_gen: v6e
topology: v6e:2x2x1
jax: 0.10.0
libtpu: 0.0.40
codegen_flags: <defaults>
</compile_context>

<pallas_src>
import functools

import jax
import jax.numpy as jnp
from jax.experimental import pallas as pl
from jax.experimental.pallas import tpu as pltpu


# ----------------------------------------------------------------------------
# Pallas kernel: fused MaskNorm for one (batch, channel-group) tile
# ----------------------------------------------------------------------------
def _sum_spatial(a):
    """Sum a (C, G, HWG) array over its (sublane, lane) axes -> (C, 1, 1)."""
    s = jnp.sum(a, axis=2, keepdims=True)      # lane reduce (big axis)
    return jnp.sum(s, axis=1, keepdims=True)   # tiny sublane reduce


def _mask_norm_kernel(x_ref, m_ref, o_ref, *, hw, eps):
    """x_ref: (1, Ct, G, HWG), m_ref: (1, MCt, G, HWG) with MCt in {1, Ct}."""
    x = x_ref[0].astype(jnp.float32)           # (Ct, G, HWG)
    m = m_ref[0].astype(jnp.float32)           # (MCt, G, HWG)
    inv_hw = 1.0 / float(hw)

    # -------- sufficient statistics (5 spatial reductions total) --------
    n_fg_raw = _sum_spatial(m)                       # (MCt,1,1)
    n_bg_raw = float(hw) - n_fg_raw                  # sum(1-m) == HW - sum(m)
    n_fg = jnp.where(n_fg_raw == 0.0, 1.0, n_fg_raw)  # PyTorch clamp-to-1
    n_bg = jnp.where(n_bg_raw == 0.0, 1.0, n_bg_raw)

    sum_xm = _sum_spatial(x * m)                     # (Ct,1,1)
    sum_x = _sum_spatial(x)                          # (Ct,1,1)
    mu_fg = sum_xm / n_fg
    mu_bg = (sum_x - sum_xm) / n_bg                  # sum(x*(1-m)) = sum(x)-sum(x*m)

    # mean(region + (1-m)*mu) == mu exactly, so the centered IN input is:
    yc_fg = m * (x - mu_fg)
    yc_bg = (1.0 - m) * (x - mu_bg)

    var_fg = _sum_spatial(yc_fg * yc_fg) * inv_hw    # biased variance over H*W
    var_bg = _sum_spatial(yc_bg * yc_bg) * inv_hw

    # fold IN's rsqrt and the sqrt(n/HW) rescale into one per-channel scalar
    scale_fg = jax.lax.rsqrt(var_fg + eps) * jnp.sqrt(n_fg * inv_hw)
    scale_bg = jax.lax.rsqrt(var_bg + eps) * jnp.sqrt(n_bg * inv_hw)

    o_ref[0] = (yc_fg * scale_fg + yc_bg * scale_bg).astype(o_ref.dtype)


# ----------------------------------------------------------------------------
# Wrapper: NCHW in / NCHW out, like the PyTorch module
# ----------------------------------------------------------------------------
def _pick_c_tile(c, target=16):
    if c <= target:
        return c
    for t in range(target, 0, -1):
        if c % t == 0:
            return t
    return c


def mask_norm(x_nchw, mask_nchw, *, eps=1e-5):
    """MaskNorm forward.  x: (B, C, H, W), mask: (B, 1 or C, H, W)."""
    B, C, H, W = x_nchw.shape
    MB, MC, MH, MW = mask_nchw.shape
    assert MB == B and (MH, MW) == (H, W) and MC in (1, C), "incompatible mask shape"
    HW = H * W

    # Sublane packing: split the spatial axis into (G=8, HW/8) so every f32
    # vreg carries 8 full sublanes even for tiny C.  Contiguous reshape only.
    G = 8 if HW % 8 == 0 else 1
    HWG = HW // G

    # Keep native dtypes; up-cast happens inside the kernel after the VMEM load.
    x = x_nchw.reshape(B, C, G, HWG)
    m = mask_nchw.reshape(B, MC, G, HWG)

    CT = _pick_c_tile(C)                 # channel-group tile
    n_cg = C // CT
    MCT = 1 if MC == 1 else CT

    if MC == 1:
        m_map = lambda b, cg: (b, 0, 0, 0)       # same mask block for every group
    else:
        m_map = lambda b, cg: (b, cg, 0, 0)

    kern = functools.partial(_mask_norm_kernel, hw=HW, eps=eps)
    out = pl.pallas_call(
        kern,
        out_shape=jax.ShapeDtypeStruct((B, C, G, HWG), x_nchw.dtype),
        grid=(B, n_cg),
        in_specs=[
            pl.BlockSpec((1, CT, G, HWG), lambda b, cg: (b, cg, 0, 0)),
            pl.BlockSpec((1, MCT, G, HWG), m_map),
        ],
        out_specs=pl.BlockSpec((1, CT, G, HWG), lambda b, cg: (b, cg, 0, 0)),
        compiler_params=pltpu.CompilerParams(
            dimension_semantics=("parallel", "parallel")),
    )(x, m)
    return out.reshape(B, C, H, W)


# ----------------------------------------------------------------------------
# Pure-JAX reference (mirrors the PyTorch module exactly) for validation
# ----------------------------------------------------------------------------
def mask_norm_ref(x, mask, eps=1e-5):
    b, c, h, w = x.shape

    def norm_region(region, msk):
        num_pixels = jnp.sum(msk, axis=(2, 3), keepdims=True)
        num_pixels = jnp.where(num_pixels == 0.0, 1.0, num_pixels)
        mu = jnp.sum(region, axis=(2, 3), keepdims=True) / num_pixels
        y = region + (1.0 - msk) * mu
        mean = jnp.mean(y, axis=(2, 3), keepdims=True)
        var = jnp.mean((y - mean) ** 2, axis=(2, 3), keepdims=True)
        y_n = (y - mean) * jax.lax.rsqrt(var + eps)
        return y_n * jnp.sqrt(num_pixels / (h * w))

    fg = norm_region(x * mask, mask)
    bg = norm_region(x * (1.0 - mask), 1.0 - mask)
    return fg + bg


# ----------------------------------------------------------------------------
if __name__ == "__main__":
    key = jax.random.PRNGKey(0)
    kx, km = jax.random.split(key)

    B, C, H, W = 2, 4, 16, 16                       # norm_nc = C = 4
    x = jax.random.normal(kx, (B, C, H, W), jnp.float32)
    mask = (jax.random.uniform(km, (B, 1, H, W)) > 0.5).astype(jnp.float32)

    out = mask_norm(x, mask)
    out = jax.block_until_ready(out)

    assert out.shape == (B, C, H, W), out.shape
    assert out.dtype == x.dtype
    assert bool(jnp.all(jnp.isfinite(out)))

    ref = mask_norm_ref(x, mask)
    assert bool(jnp.allclose(out, ref, atol=1e-4, rtol=1e-4)), (
        float(jnp.max(jnp.abs(out - ref))))

    print("KERNEL_OK")
</pallas_src>

<mosaic_0001>
module attributes {stable_mosaic.version = 11 : i64} {
  func.func @_mask_norm_kernel(%arg0: i32, %arg1: i32, %arg2: memref<1x4x8x32xf32, #tpu.memory_space<vmem>>, %arg3: memref<1x1x8x32xf32, #tpu.memory_space<vmem>>, %arg4: memref<1x4x8x32xf32, #tpu.memory_space<vmem>>) attributes {dimension_semantics = [#tpu.dimension_semantics<parallel>, #tpu.dimension_semantics<parallel>], iteration_bounds = array<i64: 2, 1>, scalar_prefetch = 0 : i64, scratch_operands = 0 : i64, tpu.core_type = #tpu.core_type<tc>, window_params = [{transform_indices = @transform_0, window_bounds = array<i64: 1, 4, 8, 32>}, {transform_indices = @transform_1, window_bounds = array<i64: 1, 1, 8, 32>}, {transform_indices = @transform_2, window_bounds = array<i64: 1, 4, 8, 32>}]} {
    %c0 = arith.constant 0 : index
    %c0_0 = arith.constant 0 : index
    %c0_1 = arith.constant 0 : index
    %c0_2 = arith.constant 0 : index
    %0 = vector.load %arg2[%c0, %c0_0, %c0_1, %c0_2] : memref<1x4x8x32xf32, #tpu.memory_space<vmem>>, vector<1x4x8x32xf32>
    %1 = vector.shape_cast %0 : vector<1x4x8x32xf32> to vector<4x8x32xf32>
    %c0_3 = arith.constant 0 : index
    %c0_4 = arith.constant 0 : index
    %c0_5 = arith.constant 0 : index
    %c0_6 = arith.constant 0 : index
    %2 = vector.load %arg3[%c0_3, %c0_4, %c0_5, %c0_6] : memref<1x1x8x32xf32, #tpu.memory_space<vmem>>, vector<1x1x8x32xf32>
    %3 = vector.shape_cast %2 : vector<1x1x8x32xf32> to vector<1x8x32xf32>
    %cst = arith.constant dense<0.000000e+00> : vector<1x8xf32>
    %4 = vector.multi_reduction <add>, %3, %cst [2] : vector<1x8x32xf32> to vector<1x8xf32>
    %5 = vector.shape_cast %4 : vector<1x8xf32> to vector<1x8x1xf32>
    %cst_7 = arith.constant dense<0.000000e+00> : vector<1x1xf32>
    %6 = vector.multi_reduction <add>, %5, %cst_7 [1] : vector<1x8x1xf32> to vector<1x1xf32>
    %7 = vector.shape_cast %6 : vector<1x1xf32> to vector<1x1x1xf32>
    %cst_8 = arith.constant 2.560000e+02 : f32
    %8 = vector.broadcast %cst_8 : f32 to vector<1x1x1xf32>
    %9 = arith.subf %8, %7 : vector<1x1x1xf32>
    %cst_9 = arith.constant 0.000000e+00 : f32
    %10 = vector.broadcast %cst_9 : f32 to vector<1x1x1xf32>
    %11 = arith.cmpf oeq, %7, %10 : vector<1x1x1xf32>
    %cst_10 = arith.constant 1.000000e+00 : f32
    %12 = vector.broadcast %cst_10 : f32 to vector<1x1x1xf32>
    %13 = arith.select %11, %12, %7 : vector<1x1x1xi1>, vector<1x1x1xf32>
    %cst_11 = arith.constant 0.000000e+00 : f32
    %14 = vector.broadcast %cst_11 : f32 to vector<1x1x1xf32>
    %15 = arith.cmpf oeq, %9, %14 : vector<1x1x1xf32>
    %cst_12 = arith.constant 1.000000e+00 : f32
    %16 = vector.broadcast %cst_12 : f32 to vector<1x1x1xf32>
    %17 = arith.select %15, %16, %9 : vector<1x1x1xi1>, vector<1x1x1xf32>
    %18 = vector.broadcast %3 : vector<1x8x32xf32> to vector<4x8x32xf32>
    %19 = arith.mulf %1, %18 : vector<4x8x32xf32>
    %cst_13 = arith.constant dense<0.000000e+00> : vector<4x8xf32>
    %20 = vector.multi_reduction <add>, %19, %cst_13 [2] : vector<4x8x32xf32> to vector<4x8xf32>
    %21 = vector.shape_cast %20 : vector<4x8xf32> to vector<4x8x1xf32>
    %cst_14 = arith.constant dense<0.000000e+00> : vector<4x1xf32>
    %22 = vector.multi_reduction <add>, %21, %cst_14 [1] : vector<4x8x1xf32> to vector<4x1xf32>
    %23 = vector.shape_cast %22 : vector<4x1xf32> to vector<4x1x1xf32>
    %cst_15 = arith.constant dense<0.000000e+00> : vector<4x8xf32>
    %24 = vector.multi_reduction <add>, %1, %cst_15 [2] : vector<4x8x32xf32> to vector<4x8xf32>
    %25 = vector.shape_cast %24 : vector<4x8xf32> to vector<4x8x1xf32>
    %cst_16 = arith.constant dense<0.000000e+00> : vector<4x1xf32>
    %26 = vector.multi_reduction <add>, %25, %cst_16 [1] : vector<4x8x1xf32> to vector<4x1xf32>
    %27 = vector.shape_cast %26 : vector<4x1xf32> to vector<4x1x1xf32>
    %28 = vector.broadcast %13 : vector<1x1x1xf32> to vector<4x1x1xf32>
    %29 = arith.divf %23, %28 : vector<4x1x1xf32>
    %30 = arith.subf %27, %23 : vector<4x1x1xf32>
    %31 = vector.broadcast %17 : vector<1x1x1xf32> to vector<4x1x1xf32>
    %32 = arith.divf %30, %31 : vector<4x1x1xf32>
    %33 = vector.broadcast %29 : vector<4x1x1xf32> to vector<4x8x32xf32>
    %34 = arith.subf %1, %33 : vector<4x8x32xf32>
    %35 = vector.broadcast %3 : vector<1x8x32xf32> to vector<4x8x32xf32>
    %36 = arith.mulf %35, %34 : vector<4x8x32xf32>
    %cst_17 = arith.constant 1.000000e+00 : f32
    %37 = vector.broadcast %cst_17 : f32 to vector<1x8x32xf32>
    %38 = arith.subf %37, %3 : vector<1x8x32xf32>
    %39 = vector.broadcast %32 : vector<4x1x1xf32> to vector<4x8x32xf32>
    %40 = arith.subf %1, %39 : vector<4x8x32xf32>
    %41 = vector.broadcast %38 : vector<1x8x32xf32> to vector<4x8x32xf32>
    %42 = arith.mulf %41, %40 : vector<4x8x32xf32>
    %43 = arith.mulf %36, %36 : vector<4x8x32xf32>
    %cst_18 = arith.constant dense<0.000000e+00> : vector<4x8xf32>
    %44 = vector.multi_reduction <add>, %43, %cst_18 [2] : vector<4x8x32xf32> to vector<4x8xf32>
    %45 = vector.shape_cast %44 : vector<4x8xf32> to vector<4x8x1xf32>
    %cst_19 = arith.constant dense<0.000000e+00> : vector<4x1xf32>
    %46 = vector.multi_reduction <add>, %45, %cst_19 [1] : vector<4x8x1xf32> to vector<4x1xf32>
    %47 = vector.shape_cast %46 : vector<4x1xf32> to vector<4x1x1xf32>
    %cst_20 = arith.constant 3.906250e-03 : f32
    %48 = vector.broadcast %cst_20 : f32 to vector<4x1x1xf32>
    %49 = arith.mulf %47, %48 : vector<4x1x1xf32>
    %50 = arith.mulf %42, %42 : vector<4x8x32xf32>
    %cst_21 = arith.constant dense<0.000000e+00> : vector<4x8xf32>
    %51 = vector.multi_reduction <add>, %50, %cst_21 [2] : vector<4x8x32xf32> to vector<4x8xf32>
    %52 = vector.shape_cast %51 : vector<4x8xf32> to vector<4x8x1xf32>
    %cst_22 = arith.constant dense<0.000000e+00> : vector<4x1xf32>
    %53 = vector.multi_reduction <add>, %52, %cst_22 [1] : vector<4x8x1xf32> to vector<4x1xf32>
    %54 = vector.shape_cast %53 : vector<4x1xf32> to vector<4x1x1xf32>
    %cst_23 = arith.constant 3.906250e-03 : f32
    %55 = vector.broadcast %cst_23 : f32 to vector<4x1x1xf32>
    %56 = arith.mulf %54, %55 : vector<4x1x1xf32>
    %cst_24 = arith.constant 9.99999974E-6 : f32
    %57 = vector.broadcast %cst_24 : f32 to vector<4x1x1xf32>
    %58 = arith.addf %49, %57 : vector<4x1x1xf32>
    %59 = math.rsqrt %58 : vector<4x1x1xf32>
    %cst_25 = arith.constant 3.906250e-03 : f32
    %60 = vector.broadcast %cst_25 : f32 to vector<1x1x1xf32>
    %61 = arith.mulf %13, %60 : vector<1x1x1xf32>
    %62 = math.sqrt %61 : vector<1x1x1xf32>
    %63 = vector.broadcast %62 : vector<1x1x1xf32> to vector<4x1x1xf32>
    %64 = arith.mulf %59, %63 : vector<4x1x1xf32>
    %cst_26 = arith.constant 9.99999974E-6 : f32
    %65 = vector.broadcast %cst_26 : f32 to vector<4x1x1xf32>
    %66 = arith.addf %56, %65 : vector<4x1x1xf32>
    %67 = math.rsqrt %66 : vector<4x1x1xf32>
    %cst_27 = arith.constant 3.906250e-03 : f32
    %68 = vector.broadcast %cst_27 : f32 to vector<1x1x1xf32>
    %69 = arith.mulf %17, %68 : vector<1x1x1xf32>
    %70 = math.sqrt %69 : vector<1x1x1xf32>
    %71 = vector.broadcast %70 : vector<1x1x1xf32> to vector<4x1x1xf32>
    %72 = arith.mulf %67, %71 : vector<4x1x1xf32>
    %73 = vector.broadcast %64 : vector<4x1x1xf32> to vector<4x8x32xf32>
    %74 = arith.mulf %36, %73 : vector<4x8x32xf32>
    %75 = vector.broadcast %72 : vector<4x1x1xf32> to vector<4x8x32xf32>
    %76 = arith.mulf %42, %75 : vector<4x8x32xf32>
    %77 = arith.addf %74, %76 : vector<4x8x32xf32>
    %c0_28 = arith.constant 0 : index
    %c0_29 = arith.constant 0 : index
    %c0_30 = arith.constant 0 : index
    %c0_31 = arith.constant 0 : index
    %78 = vector.load %arg4[%c0_28, %c0_29, %c0_30, %c0_31] : memref<1x4x8x32xf32, #tpu.memory_space<vmem>>, vector<1x4x8x32xf32>
    %79 = vector.shape_cast %78 : vector<1x4x8x32xf32> to vector<4x8x32xf32>
    %80 = vector.shape_cast %77 : vector<4x8x32xf32> to vector<1x4x8x32xf32>
    tpu.vector_store %arg4[%c0_28, %c0_29, %c0_30, %c0_31], %80 {strides = array<i32>} : memref<1x4x8x32xf32, #tpu.memory_space<vmem>>, vector<1x4x8x32xf32>,
    return
  }
  func.func @transform_0(%arg0: i32, %arg1: i32) -> (i32, i32, i32, i32) {
    %c0_i32 = arith.constant 0 : i32
    %c0_i32_0 = arith.constant 0 : i32
    %c0_i32_1 = arith.constant 0 : i32
    return %arg0, %arg1, %c0_i32, %c0_i32_0 : i32, i32, i32, i32
  }
  func.func @transform_1(%arg0: i32, %arg1: i32) -> (i32, i32, i32, i32) {
    %c0_i32 = arith.constant 0 : i32
    %c0_i32_0 = arith.constant 0 : i32
    %c0_i32_1 = arith.constant 0 : i32
    %c0_i32_2 = arith.constant 0 : i32
    return %arg0, %c0_i32, %c0_i32_0, %c0_i32_1 : i32, i32, i32, i32
  }
  func.func @transform_2(%arg0: i32, %arg1: i32) -> (i32, i32, i32, i32) {
    %c0_i32 = arith.constant 0 : i32
    %c0_i32_0 = arith.constant 0 : i32
    %c0_i32_1 = arith.constant 0 : i32
    return %arg0, %arg1, %c0_i32, %c0_i32_0 : i32, i32, i32, i32
  }
}

</mosaic_0001>

<bundles_post_ra>
// kernel: tpu_custom_call.1
= control target key start
LH: loop header
LB: loop body
LE: loop exit
PB: predicated region body
PF: predicated region fallthrough
CT: control target
= control target key end

     0   :  { %7 = vsyncpa [#allocation3], 0  ;;  %s1196_s0 = inlined_call_operand.hbm [shape: f32[2,4,8,32], index: 0, kind: input, shape index: {}]   ;;  %s1197_s1 = inlined_call_operand.hbm [shape: f32[2,1,8,32], index: 1, kind: input, shape index: {}]   ;;  %s1198_s2 = inlined_call_operand.hbm [shape: f32[2,4,8,32], index: 2, kind: output, shape index: {}]  }
   0x1   :  { %9 = vsyncpa [#allocation3 + $0x1], 0 }
   0x2   :  { %10 = vsyncpa [#allocation6], 0 }
   0x3   :  { %12 = vsyncpa [#allocation6 + $0x1], 0 }
   0x4   :  { %13 = vsyncpa [#allocation4], 0 }
   0x5   :  { %15 = vsyncpa [#allocation4 + $0x1], 0  ;;  %s895_s9 = smov 0   ;;  %s897_s10 = smov 0  }
   0x6   :  { %s899_s11 = smov 0   ;;  %s901_s12 = smov 0  }
   0x7   :  { %s903_s13 = smov 0   ;;  %s905_s14 = smov 0  }
   0x8 LB: > { %s616_s15 = sadd.s32 4294967295, %s871_s14   ;;  %s617_s16 = sadd.s32 4294967294, %s871_s14   ;;  %s871_s14 = sphi %s905_s14, %s21_s14   ;;  %s867_s13 = sphi %s903_s13, %s1209_s13   ;;  %s863_s12 = sphi %s901_s12, %s1208_s12   ;;  %s859_s11 = sphi %s899_s11, %s1207_s11   ;;  %s855_s10 = sphi %s897_s10, %s1206_s10   ;;  %s851_s9 = sphi %s895_s9, %s1205_s9  }
   0x9   : > { %s33_s17 = sadd.s32 1, %s867_s13  ;;  %s42_s18 = sadd.s32 1, %s859_s11 }
   0xa   : > { %p35_p0 = scmp.ge.s32.totalorder %s33_s17, 2  ;;  %p49_p1 = scmp.ne.s32.totalorder %s859_s11, %s855_s10 }
   0xb   : > { %p50_p2 = scmp.eq.s32.totalorder %s871_s14, 0  ;;  %p55_p3 = scmp.ne.s32.totalorder %s855_s10, %s851_s9 }
   0xc   : > { %s1211_s17 = smov (%p35_p0, %s33_s17), 0  ;;  %p56_p5 = scmp.eq.s32.totalorder %s616_s15, 0 }
   0xd   : > { %p936_p4 = por %p50_p2, %p49_p1  ;;  %s37_s20 = ssub.s32 %s867_s13, %s1211_s17 }
   0xe   : > { %p107_p6 = scmp.eq.s32.totalorder %s616_s15, 1  ;;  %p40_p7 = scmp.eq.s32.totalorder %s37_s20, 0 }
   0xf   : > { %p942_p8 = por %p56_p5, %p55_p3  ;;  %p113_p10 = scmp.eq.s32.totalorder %s617_s16, 1 }
  0x10   : > { %p946_p9 = por %p107_p6, %p49_p1  ;;  %p619_p12 = scmp.ge.s32.totalorder %s871_s14, 2 }
  0x11   : > { %s951_s23 = scalar_select %p40_p7, %s859_s11, %s42_s18  }
  0x12   : > { %p953_p11 = por %p113_p10, %p55_p3  ;;  %p653_p13 = scmp.lt.s32.totalorder %s871_s14, 2 }
  0x13   : > { %s960_s25 = sand.u32 1, %s859_s11   ;;  %s634_s27 = sshll.u32 %s867_s13, 9 }
  0x14   : > { %s620_s26 = sshll.u32 %s960_s25, 5  ;;  %s145_s30 = scalar_lea.hbm %s1196_s0, %s634_s27 }
  0x15   : > { %s137_s3 = scalar_lea.vmem [#allocation2], %s620_s26  ;;  %p969_p0 = pnand %p653_p13, %p936_p4 }
  0x16   : > { %s146_s4 = sshll.u32 %s137_s3, 4  ;;  %p625_p1 = scmp.ge.s32.totalorder %s871_s14, 1  ;;  %s147_s4 = int_to_ptr.vmem [resolvable:$true] %s146_s4 }
  0x17   : > { %s134_s6 = scalar_lea.sflag [#allocation3], %s960_s25  ;;  %p733_p2 = pneg %p969_p0 }
  0x18   : > { %s744_s7 = scalar_lea.vmem %s147_s4, 512  ;;  %s873_s8 = smov [#allocation2]  }
  0x19   : > { %p745_p3 = scmp.ne.s32.totalorder %s147_s4, %s744_s7  ;;  %s749_s15 = sshll.u32 %s873_s8, 4  ;;  %s750_s15 = int_to_ptr.vmem [resolvable:$false] %s749_s15 }
  0x1a   : > { %s751_s16 = scalar_lea.vmem %s750_s15, 1024  ;;  %p752_p4 = scmp.lt.s32.totalorder %s147_s4, %s750_s15 }
  0x1b   : > { %p747_p5 = pnand %p745_p3, %p733_p2  ;;  %p753_p7 = scmp.lt.s32.totalorder %s751_s16, %s744_s7 }
  0x1d   : > { %p748_p6 = pneg %p747_p5  ;;  %p754_p10 = por %p753_p7, %p752_p4 }
  0x1f   : > { %p755_p13 = pnand %p754_p10, %p748_p6 }
  0x21   : > { %758 = shalt.err (!%p755_p13)
}
  0x22   : > { %s874_s18 = smov 128   ;;  %s875_s19 = smov 8  }
  0x23   : > { %645 = dma.hbm_to_vmem [thread:$0]  (!%p969_p0), %s145_s30, 512, %s147_s4, %s134_s6, %s874_s18, %s874_s18, %s875_s19  }
  0x24   : > { %p172_p3 = scmp.lt.s32.totalorder %s871_s14, 3  ;;  %s623_s20 = sshll.u32 %s960_s25, 3 }
  0x25   : > { %s624_s26 = sshll.u32 %s867_s13, 7  ;;  %s160_s7 = scalar_lea.vmem [#allocation5], %s623_s20 }
  0x26   : > { %p987_p5 = pnand %p625_p1, %p172_p3  ;;  %s165_s3 = scalar_lea.hbm %s1197_s1, %s624_s26 }
  0x27   : > { %s167_s8 = sshll.u32 %s160_s7, 4  ;;  %s157_s15 = scalar_lea.sflag [#allocation6], %s960_s25  ;;  %s168_s8 = int_to_ptr.vmem [resolvable:$true] %s167_s8 }
  0x28   : > { %s772_s16 = scalar_lea.vmem %s168_s8, 128  ;;  %s876_s30 = smov [#allocation5]  }
  0x29   : > { %p773_p6 = scmp.ne.s32.totalorder %s168_s8, %s772_s16  ;;  %s777_s4 = sshll.u32 %s876_s30, 4  ;;  %s778_s4 = int_to_ptr.vmem [resolvable:$false] %s777_s4 }
  0x2a   : > { %s779_s6 = scalar_lea.vmem %s778_s4, 256  ;;  %p780_p1 = scmp.lt.s32.totalorder %s168_s8, %s778_s4 }
  0x2b   : > { %p775_p4 = pnand %p773_p6, %p733_p2  ;;  %p781_p10 = scmp.lt.s32.totalorder %s779_s6, %s772_s16 }
  0x2d   : > { %p776_p7 = pneg %p775_p4  ;;  %p782_p13 = por %p781_p10, %p780_p1 }
  0x2f   : > { %p783_p3 = pnand %p782_p13, %p776_p7 }
  0x31   : > { %786 = shalt.err (!%p783_p3)
}
  0x32   : > { %648 = dma.hbm_to_vmem [thread:$0]  (!%p969_p0), %s165_s3, 128, %s168_s8, %s157_s15  }
  0x33   : > { %176 = sbr.rel (%p987_p5) target bundleno = 438 (0x1b6), region = 28  ;;  %s1003_s25 = sand.u32 (!%p987_p5), 1, %s855_s10  }
  0x34   : > { %s626_s18 = sshll.u32 (!%p987_p5), %s1003_s25, 5  ;;  %s179_s19 = scalar_lea.sflag (!%p987_p5), [#allocation3], %s1003_s25 }
  0x35   : > { %s182_s20 = scalar_lea.vmem (!%p987_p5), [#allocation2], %s626_s18 }
  0x38   : > { %838 = dma.done.wait (%p942_p8), %s179_s19, 512  }
  0x39   : > { %840 = vsyncadd (%p942_p8), %s179_s19, 4294966784  ;;  %s627_s5 = sshll.u32 %s1003_s25, 3  ;;  %s188_s26 = scalar_lea.sflag [#allocation6], %s1003_s25 }
  0x3a   : > { %s191_s27 = scalar_lea.vmem [#allocation5], %s627_s5 }
  0x3b   : > { %842 = dma.done.wait (%p942_p8), %s188_s26, 128  }
  0x3c   : > { %844 = vsyncadd (%p942_p8), %s188_s26, 4294967168  ;;  %vm224_vm0 = vcmask 261120   ;;  %v1019_v0 = vld [vmem:[%s191_s27] sm:$0xff]  ;;  %v1033_v7 = vld [vmem:[%s182_s20 + $0x18] sm:$0xff]  ;;  %s635_s21 = sshll.u32 %s863_s12, 9  ;;  %s216_s28 = scalar_lea.vmem [#allocation7], %s626_s18 }
  0x3d   : > { %v1021_v1 = vld [vmem:[%s182_s20] sm:$0xff]  ;;  %v1023_v2 = vld [vmem:[%s182_s20 + $0x8] sm:$0xff]  ;;  %v225_v3 = vsel %vm224_vm0, %v1019_v0, 0.0  ;;  %v1035_v8 = vld [vmem:[%s182_s20 + $0x10] sm:$0xff]  ;;  %v242_v11 = vmul.f32 %v1019_v0, %v1033_v7  ;;  %v288_v17 = vsel %vm224_vm0, %v1033_v7, 0.0  ;;  %s506_s29 = sshll.u32 %s216_s28, 4  ;;  %s1144_s12 = scalar_lea.hbm %s1198_s2, %s635_s21  ;;  %s1146_s29 = int_to_ptr.vmem [resolvable:$true] %s506_s29 }
  0x3e   : > { %v279_v4 = vsel %vm224_vm0, %v1021_v1, 0.0  ;;  %v239_v5 = vmul.f32 %v1019_v0, %v1021_v1  ;;  %v240_v6 = vmul.f32 %v1019_v0, %v1023_v2  ;;  %226 = vadd.xlane.f32.xlu0 %v225_v3  ;;  %v241_v12 = vmul.f32 %v1019_v0, %v1035_v8  ;;  %s491_s8 = scalar_lea.sflag [#allocation4], %s1003_s25  ;;  %s787_s15 = scalar_lea.vmem %s1146_s29, 512 }
  0x3f   : > { %280 = vadd.xlane.f32.xlu1 %v279_v4  ;;  %v252_v13 = vsel %vm224_vm0, %v242_v11, 0.0  ;;  %v282_v15 = vsel %vm224_vm0, %v1023_v2, 0.0  ;;  %v285_v16 = vsel %vm224_vm0, %v1035_v8, 0.0  ;;  %p788_p8 = scmp.ne.s32.totalorder %s1146_s29, %s787_s15  ;;  %s877_s16 = smov [#allocation7]  }
  0x40   : > { %v243_v9 = vsel %vm224_vm0, %v239_v5, 0.0  ;;  %v246_v10 = vsel %vm224_vm0, %v240_v6, 0.0  ;;  %v249_v14 = vsel %vm224_vm0, %v241_v12, 0.0  ;;  %s791_s30 = sshll.u32 %s877_s16, 4  ;;  %s792_s30 = int_to_ptr.vmem [resolvable:$false] %s791_s30 }
  0x41   : > { %p789_p0 = pnand %p788_p8, %p946_p9  ;;  %s793_s4 = scalar_lea.vmem %s792_s30, 1024 }
  0x42   : > { %244 = vadd.xlane.f32.xlu0 %v243_v9  ;;  %p794_p5 = scmp.lt.s32.totalorder %s1146_s29, %s792_s30  ;;  %p795_p6 = scmp.lt.s32.totalorder %s793_s4, %s787_s15 }
  0x43   : > { %247 = vadd.xlane.f32.xlu1 %v246_v10  ;;  %p790_p2 = pneg %p789_p0 }
  0x44   : > { %p796_p4 = por %p795_p6, %p794_p5 }
  0x46   : > { %253 = vadd.xlane.f32.xlu0 %v252_v13  ;;  %p797_p7 = pnand %p796_p4, %p790_p2 }
  0x47   : > { %250 = vadd.xlane.f32.xlu1 %v249_v14 }
  0x4a   : > { %283 = vadd.xlane.f32.xlu0 %v282_v15 }
  0x4b   : > { %286 = vadd.xlane.f32.xlu1 %v285_v16 }
  0x4e   : > { %289 = vadd.xlane.f32.xlu0 %v288_v17 }
  0xc7   : > { %v227_v18 = vpop.xlane.xlu0 %226 }
  0xc8   : > { %v281_v19 = vpop.xlane.xlu1 %280  ;;  %v228_v20 = vrot.slane %v227_v18, 4 }
  0xc9   : > { %v291_v25 = vrot.slane %v281_v19, 4 }
  0xca   : > { %v229_v21 = vadd.f32 %v228_v20, %v227_v18 }
  0xcb   : > { %v245_v22 = vpop.xlane.xlu0 %244  ;;  %v292_v31 = vadd.f32 %v291_v25, %v281_v19 }
  0xcc   : > { %v248_v23 = vpop.xlane.xlu1 %247  ;;  %v230_v24 = vrot.slane %v229_v21, 2  ;;  %v255_v26 = vrot.slane %v245_v22, 4 }
  0xcd   : > { %v261_v27 = vrot.slane %v248_v23, 4  ;;  %v293_v42 = vrot.slane %v292_v31, 2 }
  0xce   : > { %v231_v28 = vadd.f32 %v230_v24, %v229_v21  ;;  %v256_v33 = vadd.f32 %v255_v26, %v245_v22 }
  0xcf   : > { %v254_v29 = vpop.xlane.xlu0 %253  ;;  %v262_v34 = vadd.f32 %v261_v27, %v248_v23  ;;  %v294_v52 = vadd.f32 %v293_v42, %v292_v31 }
  0xd0   : > { %v232_v30 = vrot.slane %v231_v28, 1  ;;  %v251_v32 = vpop.xlane.xlu1 %250  ;;  %v273_v35 = vrot.slane %v254_v29, 4  ;;  %v257_v44 = vrot.slane %v256_v33, 2 }
  0xd1   : > { %v267_v36 = vrot.slane %v251_v32, 4  ;;  %v263_v45 = vrot.slane %v262_v34, 2  ;;  %v295_v63 = vrot.slane %v294_v52, 1 }
  0xd2   : > { %v233_v37 = vadd.f32 %v232_v30, %v231_v28  ;;  %v274_v38 = vadd.f32 %v273_v35, %v254_v29  ;;  %v258_v53 = vadd.f32 %v257_v44, %v256_v33 }
  0xd3   : > { %v268_v39 = vadd.f32 %v267_v36, %v251_v32  ;;  %v284_v40 = vpop.xlane.xlu0 %283  ;;  %v264_v54 = vadd.f32 %v263_v45, %v262_v34  ;;  %v296_v15 = vadd.f32 %v295_v63, %v294_v52  ;;  %v337_v32 = vsub.f32 1.0, %v1019_v0 }
  0xd4   : > { %v234_v41 = vsub.f32 256.0, %v233_v37  ;;  %vm235_vm1 = vcmp.eq.f32.partialorder %v233_v37, 0.0  ;;  %v275_v46 = vrot.slane %v274_v38, 2  ;;  %v297_v48 = vrot.slane %v284_v40, 4  ;;  %v287_v50 = vpop.xlane.xlu1 %286 }
  0xd5   : > { %v1051_v43 = vsel %vm235_vm1, 1.0, %v233_v37  ;;  %v269_v47 = vrot.slane %v268_v39, 2  ;;  %v303_v58 = vrot.slane %v287_v50, 4  ;;  %v259_v3 = vrot.slane %v258_v53, 1 }
  0xd6   : > { %vm237_vm2 = vcmp.eq.f32.partialorder %v234_v41, 0.0  ;;  %707 = vrcp.f32 %v1051_v43  ;;  %v276_v55 = vadd.f32 %v275_v46, %v274_v38  ;;  %v298_v57 = vadd.f32 %v297_v48, %v284_v40 }
  0xd7   : > { %v1054_v49 = vsel %vm237_vm2, 1.0, %v234_v41  ;;  %v290_v51 = vpop.xlane.xlu0 %289  ;;  %v270_v56 = vadd.f32 %v269_v47, %v268_v39  ;;  %v304_v61 = vadd.f32 %v303_v58, %v287_v50  ;;  %v265_v4 = vrot.slane %v264_v54, 1 }
  0xd8   : > { %709 = vrcp.f32 %v1054_v49  ;;  %v309_v59 = vrot.slane %v290_v51, 4  ;;  %v299_v60 = vrot.slane %v298_v57, 2  ;;  %v277_v5 = vrot.slane %v276_v55, 1 }
  0xd9   : > { %v271_v6 = vrot.slane %v270_v56, 1  ;;  %v305_v10 = vrot.slane %v304_v61, 2  ;;  %v260_v16 = vadd.f32 %v259_v3, %v258_v53  ;;  %v266_v17 = vadd.f32 %v265_v4, %v264_v54 }
  0xda   : > { %v310_v62 = vadd.f32 %v309_v59, %v290_v51  ;;  %v300_v9 = vadd.f32 %v299_v60, %v298_v57  ;;  %v278_v18 = vadd.f32 %v277_v5, %v276_v55 }
  0xdb   : > { %v306_v13 = vadd.f32 %v305_v10, %v304_v61  ;;  %v272_v19 = vadd.f32 %v271_v6, %v270_v56  ;;  %v320_v29 = vsub.f32 %v296_v15, %v260_v16 }
  0xdc   : > { %v311_v11 = vrot.slane %v310_v62, 2  ;;  %v301_v12 = vrot.slane %v300_v9, 1 }
  0xdd   : > { %v307_v20 = vrot.slane %v306_v13, 1 }
  0xde   : > { %v312_v14 = vadd.f32 %v311_v11, %v310_v62  ;;  %v302_v23 = vadd.f32 %v301_v12, %v300_v9 }
  0xdf   : > { %v308_v30 = vadd.f32 %v307_v20, %v306_v13 }
  0xe0   : > { %v313_v21 = vrot.slane %v312_v14, 1  ;;  %v321_v37 = vsub.f32 %v302_v23, %v266_v17 }
  0xe1   : > { %v322_v38 = vsub.f32 %v308_v30, %v272_v19 }
  0xe2   : > { %v314_v31 = vadd.f32 %v313_v21, %v312_v14 }
  0xe3   : > { %v708_v22 = vpop.eup %707 }
  0xe4   : > { %v316_v24 = vmul.f32 %v708_v22, %v260_v16  ;;  %v317_v25 = vmul.f32 %v708_v22, %v266_v17  ;;  %v319_v26 = vmul.f32 %v708_v22, %v278_v18  ;;  %v318_v27 = vmul.f32 %v708_v22, %v272_v19 }
  0xe5   : > { %v710_v28 = vpop.eup %709  ;;  %v323_v39 = vsub.f32 %v314_v31, %v278_v18 }
  0xe6   : > { %v330_v33 = vsub.f32 %v1023_v2, %v317_v25  ;;  %v329_v34 = vsub.f32 %v1021_v1, %v316_v24  ;;  %v331_v35 = vsub.f32 %v1035_v8, %v318_v27  ;;  %v332_v36 = vsub.f32 %v1033_v7, %v319_v26 }
  0xe7   : > { %v325_v40 = vmul.f32 %v710_v28, %v320_v29  ;;  %v326_v47 = vmul.f32 %v710_v28, %v321_v37  ;;  %v327_v48 = vmul.f32 %v710_v28, %v322_v38  ;;  %v328_v52 = vmul.f32 %v710_v28, %v323_v39 }
  0xe8   : > { %v1063_v41 = vmul.f32 %v330_v33, %v1019_v0  ;;  %v1066_v42 = vmul.f32 %v329_v34, %v1019_v0  ;;  %v1069_v44 = vmul.f32 %v331_v35, %v1019_v0  ;;  %v1072_v45 = vmul.f32 %v332_v36, %v1019_v0 }
  0xe9   : > { %v338_v46 = vsub.f32 %v1021_v1, %v325_v40  ;;  %v339_v0 = vsub.f32 %v1023_v2, %v326_v47  ;;  %v340_v57 = vsub.f32 %v1035_v8, %v327_v48  ;;  %v341_v58 = vsub.f32 %v1033_v7, %v328_v52 }
  0xea   : > { %v347_v50 = vmul.f32 %v1063_v41, %v1063_v41  ;;  %v346_v51 = vmul.f32 %v1066_v42, %v1066_v42  ;;  %v348_v53 = vmul.f32 %v1069_v44, %v1069_v44  ;;  %v349_v54 = vmul.f32 %v1072_v45, %v1072_v45 }
  0xeb   : > { %v1083_v55 = vmul.f32 %v338_v46, %v337_v32  ;;  %v1090_v59 = vmul.f32 %v339_v0, %v337_v32  ;;  %v1098_v63 = vmul.f32 %v340_v57, %v337_v32  ;;  %v1100_v3 = vmul.f32 %v341_v58, %v337_v32 }
  0xec   : > { %v353_v1 = vsel %vm224_vm0, %v347_v50, 0.0  ;;  %v350_v56 = vsel %vm224_vm0, %v346_v51, 0.0  ;;  %v356_v60 = vsel %vm224_vm0, %v348_v53, 0.0  ;;  %v359_v61 = vsel %vm224_vm0, %v349_v54, 0.0 }
  0xed   : > { %354 = vadd.xlane.f32.xlu0 %v353_v1  ;;  %351 = vadd.xlane.f32.xlu1 %v350_v56  ;;  %v390_v62 = vmul.f32 %v1083_v55, %v1083_v55  ;;  %v391_v2 = vmul.f32 %v1090_v59, %v1090_v59  ;;  %v392_v4 = vmul.f32 %v1098_v63, %v1098_v63  ;;  %v1111_v26 = vmul.f32 0.00390625, %v1051_v43 }
  0xee   : > { %v393_v5 = vmul.f32 %v1100_v3, %v1100_v3  ;;  %v1114_v33 = vmul.f32 0.00390625, %v1054_v49 }
  0xef   : > { %v394_v7 = vsel %vm224_vm0, %v390_v62, 0.0  ;;  %v397_v8 = vsel %vm224_vm0, %v391_v2, 0.0  ;;  %v400_v6 = vsel %vm224_vm0, %v392_v4, 0.0  ;;  %711 = vrsqrt.f32 %v1111_v26 }
  0xf0   : > { %v403_v9 = vsel %vm224_vm0, %v393_v5, 0.0  ;;  %713 = vrsqrt.f32 %v1114_v33  ;;  %vm445_vm3 = vcmp.eq.f32.partialorder %v1111_v26, inf  ;;  %vm465_vm4 = vcmp.eq.f32.partialorder %v1114_v33, inf }
  0xf1   : > { %357 = vadd.xlane.f32.xlu1 %v356_v60  ;;  %360 = vadd.xlane.f32.xlu0 %v359_v61  ;;  %vm447_vm5 = vcmp.eq.f32.partialorder %v1111_v26, 0.0  ;;  %vm467_vm6 = vcmp.eq.f32.partialorder %v1114_v33, 0.0 }
  0xf5   : > { %395 = vadd.xlane.f32.xlu1 %v394_v7  ;;  %398 = vadd.xlane.f32.xlu0 %v397_v8 }
  0xf9   : > { %401 = vadd.xlane.f32.xlu1 %v400_v6  ;;  %404 = vadd.xlane.f32.xlu0 %v403_v9 }
 0x176   : > { %v352_v10 = vpop.xlane.xlu1 %351  ;;  %v355_v11 = vpop.xlane.xlu0 %354 }
 0x177   : > { %v362_v12 = vrot.slane %v352_v10, 4  ;;  %v368_v13 = vrot.slane %v355_v11, 4 }
 0x179   : > { %v363_v14 = vadd.f32 %v362_v12, %v352_v10  ;;  %v369_v15 = vadd.f32 %v368_v13, %v355_v11 }
 0x17a   : > { %v358_v16 = vpop.xlane.xlu1 %357  ;;  %v361_v17 = vpop.xlane.xlu0 %360 }
 0x17b   : > { %v364_v18 = vrot.slane %v363_v14, 2  ;;  %v370_v19 = vrot.slane %v369_v15, 2  ;;  %v374_v20 = vrot.slane %v358_v16, 4  ;;  %v380_v21 = vrot.slane %v361_v17, 4 }
 0x17d   : > { %v365_v22 = vadd.f32 %v364_v18, %v363_v14  ;;  %v371_v23 = vadd.f32 %v370_v19, %v369_v15  ;;  %v375_v24 = vadd.f32 %v374_v20, %v358_v16  ;;  %v381_v25 = vadd.f32 %v380_v21, %v361_v17 }
 0x17e   : > { %v396_v27 = vpop.xlane.xlu1 %395  ;;  %v399_v28 = vpop.xlane.xlu0 %398 }
 0x17f   : > { %v366_v29 = vrot.slane %v365_v22, 1  ;;  %v372_v30 = vrot.slane %v371_v23, 1  ;;  %v376_v31 = vrot.slane %v375_v24, 2  ;;  %v382_v32 = vrot.slane %v381_v25, 2 }
 0x180   : > { %v406_v34 = vrot.slane %v396_v27, 4  ;;  %v412_v35 = vrot.slane %v399_v28, 4 }
 0x181   : > { %v367_v36 = vadd.f32 %v366_v29, %v365_v22  ;;  %v373_v37 = vadd.f32 %v372_v30, %v371_v23  ;;  %v377_v38 = vadd.f32 %v376_v31, %v375_v24  ;;  %v383_v39 = vadd.f32 %v382_v32, %v381_v25  ;;  %v712_v24 = vpop.eup %711 }
 0x182   : > { %v407_v40 = vadd.f32 %v406_v34, %v396_v27  ;;  %v413_v46 = vadd.f32 %v412_v35, %v399_v28  ;;  %v402_v47 = vpop.xlane.xlu1 %401  ;;  %v405_v43 = vpop.xlane.xlu0 %404  ;;  %v444_v31 = vmul.f32 %v712_v24, %v1111_v26 }
 0x183   : > { %v386_v48 = vmul.f32 0.00390625, %v367_v36  ;;  %v378_v50 = vrot.slane %v377_v38, 1  ;;  %v384_v51 = vrot.slane %v383_v39, 1  ;;  %v418_v54 = vrot.slane %v402_v47, 4  ;;  %v714_v28 = vpop.eup %713 }
 0x184   : > { %v408_v52 = vrot.slane %v407_v40, 2  ;;  %v414_v53 = vrot.slane %v413_v46, 2  ;;  %v424_v49 = vrot.slane %v405_v43, 4  ;;  %v387_v0 = vmul.f32 0.00390625, %v373_v37 }
 0x185   : > { %v379_v1 = vadd.f32 %v378_v50, %v377_v38  ;;  %v385_v56 = vadd.f32 %v384_v51, %v383_v39  ;;  %v419_v60 = vadd.f32 %v418_v54, %v402_v47  ;;  %v434_v7 = vadd.f32 1e-05, %v386_v48 }
 0x186   : > { %v409_v57 = vadd.f32 %v408_v52, %v407_v40  ;;  %v415_v58 = vadd.f32 %v414_v53, %v413_v46  ;;  %v425_v61 = vadd.f32 %v424_v49, %v405_v43  ;;  %v435_v6 = vadd.f32 1e-05, %v387_v0 }
 0x187   : > { %v388_v62 = vmul.f32 0.00390625, %v379_v1  ;;  %v389_v2 = vmul.f32 0.00390625, %v385_v56  ;;  %v420_v5 = vrot.slane %v419_v60, 2  ;;  %715 = vrsqrt.f32 %v434_v7 }
 0x188   : > { %v410_v8 = vrot.slane %v409_v57, 1  ;;  %v416_v4 = vrot.slane %v415_v58, 1  ;;  %v426_v9 = vrot.slane %v425_v61, 2  ;;  %717 = vrsqrt.f32 %v435_v6 }
 0x189   : > { %v436_v10 = vadd.f32 1e-05, %v388_v62  ;;  %v421_v13 = vadd.f32 %v420_v5, %v419_v60  ;;  %v437_v14 = vadd.f32 1e-05, %v389_v2  ;;  %v464_v32 = vmul.f32 %v714_v28, %v1114_v33 }
 0x18a   : > { %v411_v11 = vadd.f32 %v410_v8, %v409_v57  ;;  %v417_v12 = vadd.f32 %v416_v4, %v415_v58  ;;  %v427_v15 = vadd.f32 %v426_v9, %v425_v61  ;;  %v446_v34 = vsel %vm445_vm3, %v1111_v26, %v444_v31 }
 0x18b   : > { %v422_v18 = vrot.slane %v421_v13, 1  ;;  %719 = vrsqrt.f32 %v436_v10  ;;  %v448_v36 = vand.u32 2147483648, %v1111_v26  ;;  %v466_v38 = vsel %vm465_vm4, %v1114_v33, %v464_v32 }
 0x18c   : > { %v430_v16 = vmul.f32 0.00390625, %v411_v11  ;;  %v431_v17 = vmul.f32 0.00390625, %v417_v12  ;;  %v428_v19 = vrot.slane %v427_v15, 1  ;;  %721 = vrsqrt.f32 %v437_v14 }
 0x18d   : > { %v423_v22 = vadd.f32 %v422_v18, %v421_v13  ;;  %v449_v40 = vsel %vm447_vm5, %v448_v36, %v446_v34  ;;  %v468_v46 = vand.u32 2147483648, %v1114_v33 }
 0x18e   : > { %v454_v20 = vadd.f32 1e-05, %v430_v16  ;;  %v455_v21 = vadd.f32 1e-05, %v431_v17  ;;  %v429_v23 = vadd.f32 %v428_v19, %v427_v15 }
 0x18f   : > { %v432_v25 = vmul.f32 0.00390625, %v423_v22  ;;  %v469_v51 = vsel %vm467_vm6, %v468_v46, %v466_v38 }
 0x190   : > { %723 = vrsqrt.f32 %v454_v20  ;;  %v433_v27 = vmul.f32 0.00390625, %v429_v23 }
 0x191   : > { %725 = vrsqrt.f32 %v455_v21  ;;  %v456_v29 = vadd.f32 1e-05, %v432_v25 }
 0x192   : > { %v457_v30 = vadd.f32 1e-05, %v433_v27 }
 0x193   : > { %727 = vrsqrt.f32 %v456_v29 }
 0x194   : > { %729 = vrsqrt.f32 %v457_v30  ;;  %v716_v35 = vpop.eup %715 }
 0x195   : > { %v718_v37 = vpop.eup %717  ;;  %v450_v43 = vmul.f32 %v716_v35, %v449_v40 }
 0x196   : > { %v451_v50 = vmul.f32 %v718_v37, %v449_v40 }
 0x197   : > { %v474_v26 = vmul.f32 %v450_v43, %v1066_v42 }
 0x198   : > { %v720_v39 = vpop.eup %719  ;;  %v475_v56 = vmul.f32 %v451_v50, %v1063_v41 }
 0x199   : > { %v722_v47 = vpop.eup %721  ;;  %v452_v49 = vmul.f32 %v720_v39, %v449_v40 }
 0x19a   : > { %v453_v57 = vmul.f32 %v722_v47, %v449_v40 }
 0x19b   : > { %v476_v42 = vmul.f32 %v452_v49, %v1069_v44 }
 0x19c   : > { %v477_v41 = vmul.f32 %v453_v57, %v1072_v45 }
 0x19d   : > { %v724_v48 = vpop.eup %723 }
 0x19e   : > { %v726_v52 = vpop.eup %725  ;;  %v470_v53 = vmul.f32 %v724_v48, %v469_v51 }
 0x19f   : > { %v471_v54 = vmul.f32 %v726_v52, %v469_v51 }
 0x1a0   : > { %v478_v0 = vmul.f32 %v470_v53, %v1083_v55  ;;  %v728_v1 = vpop.eup %727 }
 0x1a1   : > { %v479_v58 = vmul.f32 %v471_v54, %v1090_v59  ;;  %v730_v33 = vpop.eup %729  ;;  %v472_v61 = vmul.f32 %v728_v1, %v469_v51 }
 0x1a2   : > { %v482_v60 = vadd.f32 %v478_v0, %v474_v26  ;;  %v473_v2 = vmul.f32 %v730_v33, %v469_v51 }
 0x1a3   : > { %v483_v62 = vadd.f32 %v479_v58, %v475_v56  ;;  %v480_v55 = vmul.f32 %v472_v61, %v1098_v63 }
 0x1a4   : > { %486 = vst.msk [vmem:[%s216_s28] sm:$0xff] %vm224_vm0, %v482_v60  ;;  %v481_v59 = vmul.f32 %v473_v2, %v1100_v3 }
 0x1a5   : > { %487 = vst.msk [vmem:[%s216_s28 + $0x8] sm:$0xff] %vm224_vm0, %v483_v62  ;;  %v484_v7 = vadd.f32 %v480_v55, %v476_v42 }
 0x1a6   : > { %v485_v44 = vadd.f32 %v481_v59, %v477_v41 }
 0x1a7   : > { %488 = vst.msk [vmem:[%s216_s28 + $0x10] sm:$0xff] %vm224_vm0, %v484_v7 }
 0x1a8   : > { %489 = vst.msk [vmem:[%s216_s28 + $0x18] sm:$0xff] %vm224_vm0, %v485_v44 }
 0x1a9   : > { %800 = shalt.err (!%p797_p7)
}
 0x1aa   : > { %s801_s6 = scalar_lea.hbm %s1144_s12, 512  ;;  %s805_s20 = scalar_lea.hbm %s1198_s2, 1024 }
 0x1ab   : > { %p802_p1 = scmp.ne.s32.totalorder %s1144_s12, %s801_s6  ;;  %p806_p3 = scmp.lt.s32.totalorder %s1144_s12, %s1198_s2 }
 0x1ac   : > { %p807_p8 = scmp.lt.s32.totalorder %s805_s20, %s801_s6 }
 0x1ad   : > { %p803_p10 = pnand %p802_p1, %p946_p9 }
 0x1ae   : > { %p808_p0 = por %p807_p8, %p806_p3 }
 0x1af   : > { %p804_p13 = pneg %p803_p10 }
 0x1b1   : > { %p809_p2 = pnand %p808_p0, %p804_p13 }
 0x1b3   : > { %812 = shalt.err (!%p809_p2)
}
 0x1b4   : > { %s878_s27 = smov 128   ;;  %s879_s21 = smov 8  }
 0x1b5   : > { %640 = dma.vmem_to_hbm [thread:$0]  (%p946_p9), %s1146_s29, 512, %s1144_s12, %s491_s8, %s878_s27, %s878_s27, %s879_s21  }
 0x1b6 PF: > { %s521_s28 = sand.u32 1, %s851_s9   ;;  %p650_p5 = pnand %p619_p12, %p953_p11 }
 0x1b7   : > { %s522_s3 = scalar_lea.sflag [#allocation4], %s521_s28 }
 0x1b8   : > { %p651_p6 = pneg %p650_p5 }
 0x1ba   : > { %846 = dma.done.wait (%p651_p6), %s522_s3, 512  }
 0x1bb   : > { %848 = vsyncadd (%p651_p6), %s522_s3, 4294966784  ;;  %s21_s14 = sadd.s32 1, %s871_s14   ;;  %s1205_s9 = smov %s855_s10 }
 0x1bc   : > { %p18_p4 = scmp.ge.s32.totalorder %s21_s14, 4   ;;  %s1206_s10 = smov %s859_s11 }
 0x1bd   : > { %s1207_s11 = smov %s951_s23  ;;  %s1208_s12 = smov %s867_s13 }
 0x1be   : > { %s1209_s13 = smov %s1211_s17  ;;  %20 = sbr.rel (!%p18_p4) target bundleno = 8 (0x8), region = 86 }
 0x1c3   :  { %527 = vsyncpa [#allocation3], 1 }
 0x1c4   :  { %529 = vsyncpa [#allocation3 + $0x1], 1 }
 0x1c5   :  { %530 = vsyncpa [#allocation6], 1 }
 0x1c6   :  { %532 = vsyncpa [#allocation6 + $0x1], 1 }
 0x1c7   :  { %533 = vsyncpa [#allocation4], 1 }
 0x1c8   :  { %535 = vsyncpa [#allocation4 + $0x1], 1 }

</bundles_post_ra>
